<compile_context>
chip_gen: v5e
topology: v5e:2x2
jax: 0.10.0
libtpu: 0.0.40
codegen_flags: <defaults>
</compile_context>

<pallas_src>
import functools

import jax
import jax.numpy as jnp
from jax.experimental import pallas as pl
from jax.experimental.pallas import tpu as pltpu


def _embed_kernel(seed_ref, x_ref, w_ref, pos_ref, o_ref, *,
                  dropout_rate, training, groups):
    # x_ref  : (tile_rows, k_dim)   bf16  patchified input (pack patches per row)
    # w_ref  : (k_dim, lanes)       bf16  block-diagonal conv weight (grid-invariant)
    # pos_ref: (pos_rows, lanes)    f32   positional embedding + conv bias (grid-invariant)
    # o_ref  : (tile_rows, lanes)   out dtype
    acc = jnp.dot(x_ref[...], w_ref[...], preferred_element_type=jnp.float32)
    if groups == 1:
        acc = acc + pos_ref[...]
    else:
        r, l = pos_ref.shape                      # broadcast pos over the g batch elements
        acc = (acc.reshape(groups, r, l) + pos_ref[...][None, :, :]).reshape(groups * r, l)

    if training and dropout_rate > 0.0:
        # Inverted dropout; decorrelated per grid step by seeding with (seed, program_id).
        pltpu.prng_seed(seed_ref[0], pl.program_id(0))
        bits = pltpu.bitcast(pltpu.prng_random_bits(acc.shape), jnp.uint32)
        thr = jnp.uint32(min(int(dropout_rate * 4294967296.0), 4294967295))
        keep = bits >= thr                         # P(keep) = 1 - dropout_rate
        acc = jnp.where(keep, acc * (1.0 / (1.0 - dropout_rate)), 0.0)

    o_ref[...] = acc.astype(o_ref.dtype)


def _embed_kernel_eval(x_ref, w_ref, pos_ref, o_ref, *, dropout_rate, training, groups):
    _embed_kernel(None, x_ref, w_ref, pos_ref, o_ref,
                  dropout_rate=dropout_rate, training=training, groups=groups)


def embeddings_forward(x, w_conv, b_conv, pos_emb, patch_size,
                       dropout_rate=0.0, training=False, seed=0,
                       compute_dtype=jnp.bfloat16):
    """x: (B, C, D, H, W); w_conv: (E, C, p, p, p); b_conv: (E,); pos_emb: (1, n_patches, E)."""
    B, C, D, H, W = x.shape
    E = w_conv.shape[0]
    p = patch_size
    nD, nH, nW = D // p, H // p, W // p
    n_patches = nD * nH * nW
    patch_dim = C * p * p * p
    M = B * n_patches

    # --- lane packing: `pack` consecutive patches' embeddings share one 128-lane row ---------
    if E < 128 and 128 % E == 0 and n_patches % (128 // E) == 0:
        pack, lanes = 128 // E, 128
    else:
        pack, lanes = 1, ((E + 127) // 128) * 128          # fallback: pad lanes, slice after
    k_dim = pack * patch_dim
    M_rows = M // pack
    rows_per_batch = n_patches // pack

    # --- patchify (== Conv3d(kernel=stride=p)); allow_input_fusion lets XLA fold the transpose
    #     into the pallas_call input DMA instead of materializing an extra HBM copy of x. -----
    xp = x.reshape(B, C, nD, p, nH, p, nW, p)
    xp = xp.transpose(0, 2, 4, 6, 1, 3, 5, 7)              # (B, nD, nH, nW, C, p, p, p)
    patches = xp.reshape(M_rows, k_dim).astype(compute_dtype)

    # --- weights: (patch_dim, E) -> block-diagonal (pack*patch_dim, pack*E) ------------------
    w_mat = w_conv.reshape(E, patch_dim).T.astype(jnp.float32)
    if pack > 1:
        w_op = jnp.kron(jnp.eye(pack, dtype=jnp.float32), w_mat)
    else:
        w_op = jnp.pad(w_mat, ((0, 0), (0, lanes - E))) if lanes != E else w_mat
    w_op = w_op.astype(compute_dtype)

    # --- conv bias pre-fused into the positional embedding, packed the same way --------------
    pos_bias = pos_emb.reshape(n_patches, E).astype(jnp.float32) + b_conv.astype(jnp.float32)[None, :]
    if pack > 1:
        pos_op = pos_bias.reshape(rows_per_batch, lanes)
    else:
        pos_op = jnp.pad(pos_bias, ((0, 0), (0, lanes - E))) if lanes != E else pos_bias

    # --- VMEM budget (v7x has only 64 MiB per TensorCore) ------------------------------------
    try:
        vmem_cap = int(pltpu.get_tpu_info().vmem_capacity_bytes)
    except Exception:
        vmem_cap = 64 << 20
    vmem_budget = int(0.75 * vmem_cap)

    cd_item = jnp.dtype(compute_dtype).itemsize
    out_item = jnp.dtype(x.dtype).itemsize

    def _vmem_est(tile_rows, pos_rows):
        return (2 * tile_rows * k_dim * cd_item            # patches tiles (double-buffered)
                + k_dim * lanes * cd_item                  # weights   (single-buffered)
                + pos_rows * lanes * 4                     # pos+bias  (single-buffered)
                + 2 * tile_rows * lanes * out_item         # output tiles (double-buffered)
                + 2 * tile_rows * lanes * 4)               # f32 accumulator headroom

    # --- M tiling: g whole batch elements per tile; prefer >=2 grid steps (v7x megacore),
    #     tiles <= ~1024 rows, and sublane-16 alignment for the bf16 operand. -----------------
    target_rows = 1024
    candidates = []
    for g in range(1, B + 1):
        if B % g:
            continue
        tile_rows = g * rows_per_batch
        if tile_rows % 8 != 0 and g != B:                  # full-extent block is always legal
            continue
        if g == 1 or rows_per_batch % 8 == 0:
            pos_rows = rows_per_batch                      # broadcast across groups in-kernel
        else:
            pos_rows = tile_rows                           # rare fallback: tile pos in wrapper
        if _vmem_est(tile_rows, pos_rows) > vmem_budget // 2 and g != 1:
            continue
        candidates.append((g, tile_rows, pos_rows, B // g))
    if not candidates:                                     # degenerate shapes: one full tile
        tr = B * rows_per_batch
        pr = rows_per_batch if rows_per_batch % 8 == 0 else tr
        candidates.append((B, tr, pr, 1))

    def _score(c):
        g, tr, pr, nt = c
        return (nt >= 2, tr <= target_rows, tr % 16 == 0, min(tr, target_rows), -tr)

    g, tile_rows, pos_rows, num_tiles = max(candidates, key=_score)
    groups = tile_rows // pos_rows
    if pos_rows > rows_per_batch:
        pos_op = jnp.tile(pos_op, (pos_rows // rows_per_batch, 1))
    # TODO(synk): when B == 1 the grid has a single step; splitting rows_per_batch itself
    #             (pos index_map i % k) would let both v7x TensorCores work on one sample.

    est = _vmem_est(tile_rows, pos_rows)
    vmem_limit = None
    if est > (12 << 20):
        vmem_limit = int(min(max(2 * est, 32 << 20), vmem_budget))

    cost = pl.CostEstimate(
        flops=2 * M * patch_dim * E,                       # true flops (E, not padded lanes)
        transcendentals=0,
        bytes_accessed=int(M * patch_dim * out_item + k_dim * lanes * cd_item
                           + pos_rows * lanes * 4 + M_rows * lanes * out_item),
    )

    kwargs = dict(dropout_rate=float(dropout_rate), training=bool(training), groups=int(groups))
    use_dropout = bool(training) and float(dropout_rate) > 0.0
    if use_dropout:
        kernel = functools.partial(_embed_kernel, **kwargs)
        operands = (jnp.asarray([seed], dtype=jnp.int32), patches, w_op, pos_op)
        num_prefetch = 1
        fusion = [False, True, False, False]               # only the patches operand may fuse
    else:
        kernel = functools.partial(_embed_kernel_eval, **kwargs)
        operands = (patches, w_op, pos_op)
        num_prefetch = 0
        fusion = [True, False, False]

    def _call(perf_features):
        def spec(shape, index_map, bufs=None):
            if perf_features and bufs is not None:
                try:
                    return pl.BlockSpec(shape, index_map, pipeline_mode=pl.Buffered(bufs))
                except TypeError:                          # older Pallas without pipeline_mode
                    pass
            return pl.BlockSpec(shape, index_map)

        grid_spec = pltpu.PrefetchScalarGridSpec(
            num_scalar_prefetch=num_prefetch,
            grid=(num_tiles,),
            in_specs=[
                spec((tile_rows, k_dim), lambda i, *_: (i, 0)),
                spec((k_dim, lanes), lambda i, *_: (0, 0), bufs=1),    # grid-invariant
                spec((pos_rows, lanes), lambda i, *_: (0, 0), bufs=1),  # grid-invariant
            ],
            out_specs=spec((tile_rows, lanes), lambda i, *_: (i, 0)),
        )
        return pl.pallas_call(
            kernel,
            out_shape=jax.ShapeDtypeStruct((M_rows, lanes), x.dtype),
            grid_spec=grid_spec,
            compiler_params=pltpu.CompilerParams(
                dimension_semantics=("parallel",),
                vmem_limit_bytes=vmem_limit,
                allow_input_fusion=fusion if perf_features else None,
            ),
            cost_estimate=cost,
        )(*operands)

    try:
        out = _call(True)
    except Exception:
        # Conservative fallback for environments that reject the optional perf features
        # (single-buffering of invariants / input fusion); semantics are identical.
        out = _call(False)

    if pack > 1:
        return out.reshape(B, n_patches, E)                # packed layout -> free reshape
    if lanes != E:
        out = out[:, :E]
    return out.reshape(B, n_patches, E)


if __name__ == "__main__":
    # Module config: input_dim=4, embed_dim=32, cube_size=(16,16,16), patch_size=4 -> n_patches=64
    B, C, Dd, Hh, Ww = 2, 4, 16, 16, 16
    E, p = 32, 4
    n_patches = (Dd // p) * (Hh // p) * (Ww // p)

    key = jax.random.PRNGKey(0)
    kx, kw, kb = jax.random.split(key, 3)
    x = jax.random.normal(kx, (B, C, Dd, Hh, Ww), dtype=jnp.float32)
    w_conv = jax.random.normal(kw, (E, C, p, p, p), dtype=jnp.float32) * 0.02
    b_conv = jax.random.normal(kb, (E,), dtype=jnp.float32) * 0.02
    pos_emb = jnp.zeros((1, n_patches, E), dtype=jnp.float32)  # nn.Parameter(torch.zeros(...))

    # eval-mode forward (dropout is identity, matching module.eval())
    out = embeddings_forward(x, w_conv, b_conv, pos_emb, patch_size=p,
                             dropout_rate=0.1, training=False, seed=1234)
    out = jax.block_until_ready(out)

    # plain-JAX reference (same bf16 operand rounding, f32 accumulation)
    xp = x.reshape(B, C, Dd // p, p, Hh // p, p, Ww // p, p)
    xp = xp.transpose(0, 2, 4, 6, 1, 3, 5, 7).reshape(B, n_patches, C * p * p * p)
    w_mat = w_conv.reshape(E, -1).T
    xb = xp.astype(jnp.bfloat16).astype(jnp.float32)
    wb = w_mat.astype(jnp.bfloat16).astype(jnp.float32)
    ref = jnp.einsum("bnk,ke->bne", xb, wb, precision=jax.lax.Precision.HIGHEST)
    ref = ref + b_conv[None, None, :] + pos_emb

    assert out.shape == (B, n_patches, E)
    assert jnp.allclose(out, ref, atol=1e-3, rtol=1e-3)

    print("KERNEL_OK")
</pallas_src>

<mosaic_0001>
module attributes {stable_mosaic.version = 11 : i64} {
  func.func @_embed_kernel_eval(%arg0: i32, %arg1: memref<16x1024xbf16, #tpu.memory_space<vmem>>, %arg2: memref<1024x128xbf16, #tpu.memory_space<vmem>>, %arg3: memref<16x128xf32, #tpu.memory_space<vmem>>, %arg4: memref<16x128xf32, #tpu.memory_space<vmem>>) attributes {dimension_semantics = [#tpu.dimension_semantics<parallel>], iteration_bounds = array<i64: 2>, scalar_prefetch = 0 : i64, scratch_operands = 0 : i64, tpu.core_type = #tpu.core_type<tc>, window_params = [{transform_indices = @transform_0, window_bounds = array<i64: 16, 1024>}, {pipeline_mode = #tpu.pipeline_mode<synchronous>, transform_indices = @transform_1, window_bounds = array<i64: 1024, 128>}, {pipeline_mode = #tpu.pipeline_mode<synchronous>, transform_indices = @transform_2, window_bounds = array<i64: 16, 128>}, {transform_indices = @transform_3, window_bounds = array<i64: 16, 128>}]} {
    %c0 = arith.constant 0 : index
    %c0_0 = arith.constant 0 : index
    %0 = vector.load %arg1[%c0, %c0_0] : memref<16x1024xbf16, #tpu.memory_space<vmem>>, vector<16x1024xbf16>
    %c0_1 = arith.constant 0 : index
    %c0_2 = arith.constant 0 : index
    %1 = vector.load %arg2[%c0_1, %c0_2] : memref<1024x128xbf16, #tpu.memory_space<vmem>>, vector<1024x128xbf16>
    %cst = arith.constant dense<0.000000e+00> : vector<16x128xf32>
    %2 = tpu.matmul %0, %1, %cst {dimension_numbers = #tpu.dot_dimension_numbers<[1], [0], [0], [1], [0, 0, 1, 1], [], []>} : vector<16x1024xbf16>, vector<1024x128xbf16>, vector<16x128xf32> -> vector<16x128xf32>
    %c0_3 = arith.constant 0 : index
    %c0_4 = arith.constant 0 : index
    %3 = vector.load %arg3[%c0_3, %c0_4] : memref<16x128xf32, #tpu.memory_space<vmem>>, vector<16x128xf32>
    %4 = arith.addf %2, %3 : vector<16x128xf32>
    %c0_5 = arith.constant 0 : index
    %c0_6 = arith.constant 0 : index
    %5 = vector.load %arg4[%c0_5, %c0_6] : memref<16x128xf32, #tpu.memory_space<vmem>>, vector<16x128xf32>
    tpu.vector_store %arg4[%c0_5, %c0_6], %4 {strides = array<i32>} : memref<16x128xf32, #tpu.memory_space<vmem>>, vector<16x128xf32>,
    return
  }
  func.func @transform_0(%arg0: i32) -> (i32, i32) {
    %c0_i32 = arith.constant 0 : i32
    %c0_i32_0 = arith.constant 0 : i32
    return %arg0, %c0_i32 : i32, i32
  }
  func.func @transform_1(%arg0: i32) -> (i32, i32) {
    %c0_i32 = arith.constant 0 : i32
    %c0_i32_0 = arith.constant 0 : i32
    %c0_i32_1 = arith.constant 0 : i32
    return %c0_i32, %c0_i32_0 : i32, i32
  }
  func.func @transform_2(%arg0: i32) -> (i32, i32) {
    %c0_i32 = arith.constant 0 : i32
    %c0_i32_0 = arith.constant 0 : i32
    %c0_i32_1 = arith.constant 0 : i32
    return %c0_i32, %c0_i32_0 : i32, i32
  }
  func.func @transform_3(%arg0: i32) -> (i32, i32) {
    %c0_i32 = arith.constant 0 : i32
    %c0_i32_0 = arith.constant 0 : i32
    return %arg0, %c0_i32 : i32, i32
  }
}

module attributes {stable_mosaic.version = 11 : i64} {
  func.func @_embed_kernel_eval(%arg0: i32, %arg1: memref<16x1024xbf16, #tpu.memory_space<vmem>>, %arg2: memref<1024x128xbf16, #tpu.memory_space<vmem>>, %arg3: memref<16x128xf32, #tpu.memory_space<vmem>>, %arg4: memref<16x128xf32, #tpu.memory_space<vmem>>) attributes {dimension_semantics = [#tpu.dimension_semantics<parallel>], iteration_bounds = array<i64: 2>, scalar_prefetch = 0 : i64, scratch_operands = 0 : i64, tpu.core_type = #tpu.core_type<tc>, window_params = [{transform_indices = @transform_0, window_bounds = array<i64: 16, 1024>}, {pipeline_mode = #tpu.pipeline_mode<synchronous>, transform_indices = @transform_1, window_bounds = array<i64: 1024, 128>}, {pipeline_mode = #tpu.pipeline_mode<synchronous>, transform_indices = @transform_2, window_bounds = array<i64: 16, 128>}, {transform_indices = @transform_3, window_bounds = array<i64: 16, 128>}]} {
    %c0 = arith.constant 0 : index
    %c0_0 = arith.constant 0 : index
    %0 = vector.load %arg1[%c0, %c0_0] : memref<16x1024xbf16, #tpu.memory_space<vmem>>, vector<16x1024xbf16>
    %c0_1 = arith.constant 0 : index
    %c0_2 = arith.constant 0 : index
    %1 = vector.load %arg2[%c0_1, %c0_2] : memref<1024x128xbf16, #tpu.memory_space<vmem>>, vector<1024x128xbf16>
    %cst = arith.constant dense<0.000000e+00> : vector<16x128xf32>
    %2 = tpu.matmul %0, %1, %cst {dimension_numbers = #tpu.dot_dimension_numbers<[1], [0], [0], [1], [0, 0, 1, 1], [], []>} : vector<16x1024xbf16>, vector<1024x128xbf16>, vector<16x128xf32> -> vector<16x128xf32>
    %c0_3 = arith.constant 0 : index
    %c0_4 = arith.constant 0 : index
    %3 = vector.load %arg3[%c0_3, %c0_4] : memref<16x128xf32, #tpu.memory_space<vmem>>, vector<16x128xf32>
    %4 = arith.addf %2, %3 : vector<16x128xf32>
    %c0_5 = arith.constant 0 : index
    %c0_6 = arith.constant 0 : index
    %5 = vector.load %arg4[%c0_5, %c0_6] : memref<16x128xf32, #tpu.memory_space<vmem>>, vector<16x128xf32>
    tpu.vector_store %arg4[%c0_5, %c0_6], %4 {strides = array<i32>} : memref<16x128xf32, #tpu.memory_space<vmem>>, vector<16x128xf32>,
    return
  }
  func.func @transform_0(%arg0: i32) -> (i32, i32) {
    %c0_i32 = arith.constant 0 : i32
    %c0_i32_0 = arith.constant 0 : i32
    return %arg0, %c0_i32 : i32, i32
  }
  func.func @transform_1(%arg0: i32) -> (i32, i32) {
    %c0_i32 = arith.constant 0 : i32
    %c0_i32_0 = arith.constant 0 : i32
    %c0_i32_1 = arith.constant 0 : i32
    return %c0_i32, %c0_i32_0 : i32, i32
  }
  func.func @transform_2(%arg0: i32) -> (i32, i32) {
    %c0_i32 = arith.constant 0 : i32
    %c0_i32_0 = arith.constant 0 : i32
    %c0_i32_1 = arith.constant 0 : i32
    return %c0_i32, %c0_i32_0 : i32, i32
  }
  func.func @transform_3(%arg0: i32) -> (i32, i32) {
    %c0_i32 = arith.constant 0 : i32
    %c0_i32_0 = arith.constant 0 : i32
    return %arg0, %c0_i32 : i32, i32
  }
}

</mosaic_0001>

<bundles_post_ra>
// kernel: tpu_custom_call.1
= control target key start
LH: loop header
LB: loop body
LE: loop exit
PB: predicated region body
PF: predicated region fallthrough
CT: control target
= control target key end

     0   :  { %8 = vsyncpa [#allocation3], 0  ;;  %s1820_s0 = inlined_call_operand.hbm [shape: bf16[32,1024], index: 0, kind: input, shape index: {}]   ;;  %s1821_s1 = inlined_call_operand.hbm [shape: bf16[1024,128], index: 1, kind: input, shape index: {}]   ;;  %s1822_s2 = inlined_call_operand.hbm [shape: f32[16,128], index: 2, kind: input, shape index: {}]   ;;  %s1823_s3 = inlined_call_operand.hbm [shape: f32[32,128], index: 3, kind: output, shape index: {}]  }
   0x1   :  { %10 = vsyncpa [#allocation3 + $0x1], 0 }
   0x2   :  { %11 = vsyncpa [#allocation6], 0 }
   0x3   :  { %12 = vsyncpa [#allocation4], 0 }
   0x4   :  { %14 = vsyncpa [#allocation4 + $0x1], 0  ;;  %s1660_s12 = smov 0   ;;  %s1662_s13 = smov 0  }
   0x5   :  { %s1664_s14 = smov 0   ;;  %s1666_s15 = smov 0  }
   0x6 LB: > { %s1681_s16 = sadd.s32 4294967295, %s1628_s15   ;;  %s1011_s17 = sadd.s32 4294967294, %s1628_s15   ;;  %s1628_s15 = sphi %s1666_s15, %s1833_s15   ;;  %s1624_s14 = sphi %s1664_s14, %s1832_s14   ;;  %s1620_s13 = sphi %s1662_s13, %s1831_s13   ;;  %s1616_s12 = sphi %s1660_s12, %s1830_s12  }
   0x7   : > { %p40_p0 = scmp.ne.s32.totalorder %s1620_s13, %s1616_s12  ;;  %p41_p1 = scmp.eq.s32.totalorder %s1681_s16, 0 }
   0x8   : > { %p106_p2 = scmp.eq.s32.totalorder %s1681_s16, 1  ;;  %p112_p3 = scmp.eq.s32.totalorder %s1011_s17, 1 }
   0x9   : > { %p1690_p4 = por %p41_p1, %p40_p0  ;;  %p1012_p5 = scmp.ge.s32.totalorder %s1628_s15, 1 }
   0xa   : > { %p1695_p6 = por %p112_p3, %p40_p0  ;;  %p119_p7 = scmp.lt.s32.totalorder %s1628_s15, 3 }
   0xb   : > { %s130_s22 = sshll.u32 %s1821_s1, 4  ;;  %s1630_s24 = smov [#allocation5]   ;;  %s131_s22 = int_to_ptr.hbm [resolvable:$true] %s130_s22 }
   0xc   : > { %p1703_p8 = pnand %p1012_p5, %p119_p7  ;;  %s132_s25 = sshll.u32 %s1630_s24, 4  ;;  %s133_s25 = int_to_ptr.vmem [resolvable:$true] %s132_s25 }
   0xd   : > { %s144_s28 = sshll.u32 %s1822_s2, 4  ;;  %s1631_s29 = smov 64   ;;  %s145_s28 = int_to_ptr.hbm [resolvable:$true] %s144_s28 }
   0xe   : > { %p1405_p9 = pneg %p1703_p8  ;;  %s1632_s30 = smov 4  }
   0xf   : > { %s1633_s4 = smov [#allocation7]   ;;  %s1634_s6 = smov 128  }
  0x10   : > { %p1406_p10 = pnand %p1405_p9, %p41_p1  ;;  %s146_s5 = sshll.u32 %s1633_s4, 4  ;;  %s147_s5 = int_to_ptr.vmem [resolvable:$true] %s146_s5 }
  0x11   : > { %s1635_s7 = smov 8   ;;  %s1716_s8 = sadd.s32 1, %s1628_s15  }
  0x12   : > { %1408 = dma.hbm_to_vmem [thread:$0]  (!%p1406_p10), %s131_s22, 8192, %s133_s25, [#allocation6], %s1631_s29, %s1631_s29, %s1632_s30  }
  0x13   : > { %1411 = dma.hbm_to_vmem [thread:$0]  (!%p1406_p10), %s145_s28, 256, %s147_s5, [#allocation6], %s1634_s6, %s1634_s6, %s1635_s7  }
  0x14   : > { %s24_s9 = ssub.s32 %s1628_s15, %s1716_s8  ;;  %s27_s10 = sadd.s32 1, %s1624_s14 }
  0x15   : > { %p25_p12 = scmp.eq.s32.totalorder %s24_s9, 0  ;;  %p34_p13 = scmp.ne.s32.totalorder %s1624_s14, %s1620_s13 }
  0x16   : > { %p35_p0 = scmp.eq.s32.totalorder %s1628_s15, 0  ;;  %p1422_p7 = scmp.lt.s32.totalorder %s1628_s15, 2 }
  0x17   : > { %s1725_s11 = scalar_select %p25_p12, %s1624_s14, %s27_s10  }
  0x18   : > { %p36_p3 = por %p35_p0, %p34_p13  ;;  %p1729_p5 = por %p106_p2, %p34_p13 }
  0x19   : > { %s160_s20 = sand.u32 1, %s1624_s14   ;;  %s1319_s22 = sshll.u32 %s1628_s15, 6 }
  0x1a   : > { %s1016_s21 = sshll.u32 %s160_s20, 6  ;;  %s170_s26 = scalar_lea.hbm %s1820_s0, %s1319_s22 }
  0x1b   : > { %s164_s27 = scalar_lea.vmem [#allocation2], %s1016_s21  ;;  %s171_s29 = sshll.u32 %s170_s26, 4  ;;  %s172_s29 = int_to_ptr.hbm [resolvable:$true] %s171_s29 }
  0x1c   : > { %s173_s28 = sshll.u32 %s164_s27, 4  ;;  %p1739_p9 = pnand %p1422_p7, %p36_p3  ;;  %s174_s28 = int_to_ptr.vmem [resolvable:$true] %s173_s28 }
  0x1d   : > { %s161_s4 = scalar_lea.sflag [#allocation3], %s160_s20  ;;  %s1528_s5 = sshra.s32 %s172_s29, 4  ;;  %s1529_s5 = int_to_ptr.hbm [resolvable:$true] %s1528_s5 }
  0x1e   : > { %s1530_s6 = scalar_lea.hbm %s1529_s5, 64  ;;  %p1532_p10 = pneg %p1739_p9 }
  0x1f   : > { %p1531_p2 = scmp.ne.s32.totalorder %s1529_s5, %s1530_s6  ;;  %s1535_s10 = scalar_lea.hbm %s1820_s0, 128 }
  0x20   : > { %p1536_p0 = scmp.lt.s32.totalorder %s1529_s5, %s1820_s0  ;;  %p1537_p3 = scmp.lt.s32.totalorder %s1535_s10, %s1530_s6 }
  0x21   : > { %p1533_p12 = pnand %p1532_p10, %p1531_p2 }
  0x22   : > { %p1538_p7 = por %p1537_p3, %p1536_p0 }
  0x23   : > { %p1534_p13 = pneg %p1533_p12 }
  0x25   : > { %p1539_p11 = pnand %p1538_p7, %p1534_p13 }
  0x27   : > { %1542 = shalt.err (!%p1539_p11)
}
  0x28   : > { %s1636_s20 = smov 512   ;;  %s1637_s24 = smov 32  }
  0x29   : > { %1415 = dma.hbm_to_vmem [thread:$0]  (!%p1739_p9), %s172_s29, 1024, %s174_s28, %s161_s4, %s1636_s20, %s1636_s20, %s1637_s24  }
  0x2a   : > { %185 = sbr.rel (%p1703_p8) target bundleno = 264 (0x108), region = 32  ;;  %s1756_s25 = sand.u32 (!%p1703_p8), 1, %s1620_s13  }
  0x2b   : > { %s1021_s26 = sshll.u32 (!%p1703_p8), %s1756_s25, 6  ;;  %s188_s27 = scalar_lea.sflag (!%p1703_p8), [#allocation3], %s1756_s25 }
  0x2c   : > { %s1760_s5 = scalar_lea.vmem (!%p1703_p8), [#allocation2], %s1021_s26 }
  0x2f   : > { %1603 = dma.done.wait (%p1690_p4), %s188_s27, 1024  }
  0x30   : > { %1605 = vsyncadd (%p1690_p4), %s188_s27, 4294966272 }
  0x31   : > { %1607 = dma.done.wait (%p41_p1), [#allocation6], 8448  }
  0x32   : > { %1609 = vsyncadd (%p41_p1), [#allocation6], 4294958848  ;;  %v1335_v0 = vld [vmem:[#allocation5 + $0x38] sm:$0xff]  ;;  %v1334_v4 = vld [vmem:[#allocation5 + $0x30] sm:$0xff]  ;;  %s1024_s18 = sshll.u32 %s1756_s25, 4  ;;  %s1392_s23 = sshll.u32 %s1681_s16, 4 }
  0x33   : > { %v1343_v1 = vld [vmem:[#allocation5 + $0x78] sm:$0xff]  ;;  %789 = vmatpush.bf16.msra.mxu0 %v1335_v0  ;;  %v1342_v5 = vld [vmem:[#allocation5 + $0x70] sm:$0xff]  ;;  %v1333_v8 = vld [vmem:[#allocation5 + $0x28] sm:$0xff]  ;;  %s915_s30 = scalar_lea.hbm %s1823_s3, %s1392_s23  ;;  %s224_s4 = scalar_lea.vmem [#allocation8], %s1024_s18 }
  0x34   : > { %v1351_v2 = vld [vmem:[#allocation5 + $0xb8] sm:$0xff]  ;;  %803 = vmatpush.bf16.msra.mxu1 %v1343_v1  ;;  %v1350_v6 = vld [vmem:[#allocation5 + $0xb0] sm:$0xff]  ;;  %v1341_v9 = vld [vmem:[#allocation5 + $0x68] sm:$0xff]  ;;  %s916_s6 = sshll.u32 %s224_s4, 4  ;;  %s918_s7 = sshll.u32 %s915_s30, 4  ;;  %s917_s6 = int_to_ptr.vmem [resolvable:$true] %s916_s6  ;;  %s919_s7 = int_to_ptr.hbm [resolvable:$true] %s918_s7 }
  0x35   : > { %v1359_v3 = vld [vmem:[#allocation5 + $0xf8] sm:$0xff]  ;;  %817 = vmatpush.bf16.msra.mxu2 %v1351_v2  ;;  %v1358_v7 = vld [vmem:[#allocation5 + $0xf0] sm:$0xff]  ;;  %v1349_v10 = vld [vmem:[#allocation5 + $0xa8] sm:$0xff]  ;;  %s904_s16 = scalar_lea.sflag [#allocation4], %s1756_s25  ;;  %s1572_s9 = sshra.s32 %s919_s7, 4  ;;  %s1573_s9 = int_to_ptr.hbm [resolvable:$true] %s1572_s9 }
  0x36   : > { %831 = vmatpush.bf16.msra.mxu3 %v1359_v3  ;;  %v1357_v11 = vld [vmem:[#allocation5 + $0xe8] sm:$0xff]  ;;  %v1332_v12 = vld [vmem:[#allocation5 + $0x20] sm:$0xff]  ;;  %v1331_v16 = vld [vmem:[#allocation5 + $0x18] sm:$0xff]  ;;  %s1574_s10 = scalar_lea.hbm %s1573_s9, 16  ;;  %s1578_s20 = scalar_lea.hbm %s1823_s3, 32 }
  0x37   : > { %790 = vmatpush.bf16.msra.mxu0 %v1334_v4  ;;  %v1340_v13 = vld [vmem:[#allocation5 + $0x60] sm:$0xff]  ;;  %v1339_v17 = vld [vmem:[#allocation5 + $0x58] sm:$0xff]  ;;  %v1330_v20 = vld [vmem:[#allocation5 + $0x10] sm:$0xff]  ;;  %p1575_p1 = scmp.ne.s32.totalorder %s1573_s9, %s1574_s10  ;;  %p1579_p11 = scmp.lt.s32.totalorder %s1573_s9, %s1823_s3 }
  0x38   : > { %804 = vmatpush.bf16.msra.mxu1 %v1342_v5  ;;  %v1348_v14 = vld [vmem:[#allocation5 + $0xa0] sm:$0xff]  ;;  %v1347_v18 = vld [vmem:[#allocation5 + $0x98] sm:$0xff]  ;;  %v1338_v21 = vld [vmem:[#allocation5 + $0x50] sm:$0xff]  ;;  %p1580_p9 = scmp.lt.s32.totalorder %s1578_s20, %s1574_s10 }
  0x39   : > { %818 = vmatpush.bf16.msra.mxu2 %v1350_v6  ;;  %v1356_v15 = vld [vmem:[#allocation5 + $0xe0] sm:$0xff]  ;;  %v1355_v19 = vld [vmem:[#allocation5 + $0xd8] sm:$0xff]  ;;  %v1346_v22 = vld [vmem:[#allocation5 + $0x90] sm:$0xff]  ;;  %p1576_p4 = pnand %p1575_p1, %p1729_p5 }
  0x3a   : > { %832 = vmatpush.bf16.msra.mxu3 %v1358_v7  ;;  %v1354_v23 = vld [vmem:[#allocation5 + $0xd0] sm:$0xff]  ;;  %v1329_v24 = vld [vmem:[#allocation5 + $0x8] sm:$0xff]  ;;  %v1328_v28 = vld [vmem:[#allocation5] sm:$0xff]  ;;  %p1581_p2 = por %p1580_p9, %p1579_p11 }
  0x3b   : > { %791 = vmatpush.bf16.msra.mxu0 %v1333_v8  ;;  %v1337_v25 = vld [vmem:[#allocation5 + $0x48] sm:$0xff]  ;;  %v1336_v29 = vld [vmem:[#allocation5 + $0x40] sm:$0xff]  ;;  %v1367_v32 = vld [vmem:[#allocation5 + $0x138] sm:$0xff]  ;;  %p1577_p8 = pneg %p1576_p4 }
  0x3c   : > { %805 = vmatpush.bf16.msra.mxu1 %v1341_v9  ;;  %v1345_v26 = vld [vmem:[#allocation5 + $0x88] sm:$0xff]  ;;  %v1344_v30 = vld [vmem:[#allocation5 + $0x80] sm:$0xff]  ;;  %v1375_v33 = vld [vmem:[#allocation5 + $0x178] sm:$0xff] }
  0x3d   : > { %819 = vmatpush.bf16.msra.mxu2 %v1349_v10  ;;  %v1353_v27 = vld [vmem:[#allocation5 + $0xc8] sm:$0xff]  ;;  %v1352_v31 = vld [vmem:[#allocation5 + $0xc0] sm:$0xff]  ;;  %v1383_v42 = vld [vmem:[#allocation5 + $0x1b8] sm:$0xff]  ;;  %p1582_p10 = pnand %p1581_p2, %p1577_p8 }
  0x3e   : > { %833 = vmatpush.bf16.msra.mxu3 %v1357_v11  ;;  %v1035_v34 = vld [vmem:[%s1760_s5 + $0x8] sm:$0xf]  ;;  %v1027_v36 = vld [vmem:[%s1760_s5] sm:$0xf]  ;;  %v1321_v38 = vld [vmem:[%s1760_s5 + $0xc] sm:$0xf] }
  0x3f   : > { %792 = vmatpush.bf16.msra.mxu0 %v1332_v12  ;;  %v1325_v35 = vld [vmem:[%s1760_s5 + $0x24] sm:$0xf0]  ;;  %v1324_v37 = vld [vmem:[%s1760_s5 + $0x1c] sm:$0xf0]  ;;  %v1037_v39 = vld [vmem:[%s1760_s5 + $0x28] sm:$0xf0] }
  0x40   : > { %806 = vmatpush.bf16.msra.mxu1 %v1340_v13  ;;  %v1320_v40 = vld [vmem:[%s1760_s5 + $0x4] sm:$0xf]  ;;  %v1391_v43 = vld [vmem:[#allocation5 + $0x1f8] sm:$0xff]  ;;  %v1036_v44 = vor.u32 %v1325_v35, %v1035_v34  ;;  %v1028_v45 = vor.u32 %v1324_v37, %v1027_v36  ;;  %v1040_v46 = vor.u32 %v1321_v38, %v1037_v39  ;;  %v1366_v48 = vld [vmem:[#allocation5 + $0x130] sm:$0xff] }
  0x41   : > { %820 = vmatpush.bf16.msra.mxu2 %v1348_v14  ;;  %v1029_v41 = vld [vmem:[%s1760_s5 + $0x20] sm:$0xf0]  ;;  %v1374_v49 = vld [vmem:[#allocation5 + $0x170] sm:$0xff]  ;;  %v1365_v52 = vld [vmem:[#allocation5 + $0x128] sm:$0xff] }
  0x42   : > { %834 = vmatpush.bf16.msra.mxu3 %v1356_v15  ;;  %v1032_v47 = vor.u32 %v1320_v40, %v1029_v41  ;;  %v1382_v50 = vld [vmem:[#allocation5 + $0x1b0] sm:$0xff]  ;;  %v1373_v53 = vld [vmem:[#allocation5 + $0x168] sm:$0xff]  ;;  %v1364_v56 = vld [vmem:[#allocation5 + $0x120] sm:$0xff] }
  0x43   : > { %793 = vmatpush.bf16.msra.mxu0 %v1331_v16  ;;  %v1390_v51 = vld [vmem:[#allocation5 + $0x1f0] sm:$0xff]  ;;  %v1381_v54 = vld [vmem:[#allocation5 + $0x1a8] sm:$0xff]  ;;  %v1372_v57 = vld [vmem:[#allocation5 + $0x160] sm:$0xff] }
  0x44   : > { %807 = vmatpush.bf16.msra.mxu1 %v1339_v17  ;;  %v1389_v55 = vld [vmem:[#allocation5 + $0x1e8] sm:$0xff]  ;;  %v1380_v58 = vld [vmem:[#allocation5 + $0x1a0] sm:$0xff]  ;;  %v1363_v60 = vld [vmem:[#allocation5 + $0x118] sm:$0xff] }
  0x45   : > { %821 = vmatpush.bf16.msra.mxu2 %v1347_v18  ;;  %v1388_v59 = vld [vmem:[#allocation5 + $0x1e0] sm:$0xff]  ;;  %v1371_v61 = vld [vmem:[#allocation5 + $0x158] sm:$0xff]  ;;  %v1362_v0 = vld [vmem:[#allocation5 + $0x110] sm:$0xff] }
  0x46   : > { %835 = vmatpush.bf16.msra.mxu3 %v1355_v19  ;;  %v1379_v62 = vld [vmem:[#allocation5 + $0x198] sm:$0xff]  ;;  %v1370_v1 = vld [vmem:[#allocation5 + $0x150] sm:$0xff]  ;;  %v1361_v4 = vld [vmem:[#allocation5 + $0x108] sm:$0xff] }
  0x47   : > { %794 = vmatpush.bf16.msra.mxu0 %v1330_v20  ;;  %v1387_v63 = vld [vmem:[#allocation5 + $0x1d8] sm:$0xff]  ;;  %v1378_v2 = vld [vmem:[#allocation5 + $0x190] sm:$0xff]  ;;  %v1369_v5 = vld [vmem:[#allocation5 + $0x148] sm:$0xff] }
  0x48   : > { %808 = vmatpush.bf16.msra.mxu1 %v1338_v21  ;;  %v1386_v3 = vld [vmem:[#allocation5 + $0x1d0] sm:$0xff]  ;;  %v1377_v6 = vld [vmem:[#allocation5 + $0x188] sm:$0xff]  ;;  %v1360_v8 = vld [vmem:[#allocation5 + $0x100] sm:$0xff] }
  0x49   : > { %822 = vmatpush.bf16.msra.mxu2 %v1346_v22  ;;  %v1385_v7 = vld [vmem:[#allocation5 + $0x1c8] sm:$0xff]  ;;  %v1368_v9 = vld [vmem:[#allocation5 + $0x140] sm:$0xff]  ;;  %v1043_v12 = vld [vmem:[%s1760_s5 + $0x10] sm:$0xf] }
  0x4a   : > { %836 = vmatpush.bf16.msra.mxu3 %v1354_v23  ;;  %v1376_v10 = vld [vmem:[#allocation5 + $0x180] sm:$0xff]  ;;  %v1326_v13 = vld [vmem:[%s1760_s5 + $0x2c] sm:$0xf0]  ;;  %v1322_v14 = vld [vmem:[%s1760_s5 + $0x14] sm:$0xf] }
  0x4b   : > { %795 = vmatpush.bf16.msra.mxu0 %v1329_v24  ;;  %v1384_v11 = vld [vmem:[#allocation5 + $0x1c0] sm:$0xff]  ;;  %v1045_v15 = vld [vmem:[%s1760_s5 + $0x30] sm:$0xf0]  ;;  %v1051_v16 = vld [vmem:[%s1760_s5 + $0x18] sm:$0xf]  ;;  %v1044_v20 = vor.u32 %v1326_v13, %v1043_v12 }
  0x4c   : > { %809 = vmatpush.bf16.msra.mxu1 %v1337_v25  ;;  %v1327_v17 = vld [vmem:[%s1760_s5 + $0x34] sm:$0xf0]  ;;  %v1323_v18 = vld [vmem:[%s1760_s5 + $0x1c] sm:$0xf]  ;;  %v1048_v21 = vor.u32 %v1322_v14, %v1045_v15  ;;  %v363_v25 = vld [vmem:[#allocation7] sm:$0xff] }
  0x4d   : > { %823 = vmatpush.bf16.msra.mxu2 %v1345_v26  ;;  %v1053_v19 = vld [vmem:[%s1760_s5 + $0x38] sm:$0xf0]  ;;  %v1052_v22 = vor.u32 %v1327_v17, %v1051_v16 }
  0x4e   : > { %837 = vmatpush.bf16.msra.mxu3 %v1353_v27  ;;  %v1056_v23 = vor.u32 %v1323_v18, %v1053_v19 }
  0x4f   : > { %796 = vmatpush.bf16.msra.mxu0 %v1328_v28 }
  0x50   : > { %810 = vmatpush.bf16.msra.mxu1 %v1336_v29 }
  0x51   : > { %824 = vmatpush.bf16.msra.mxu2 %v1344_v30 }
  0x52   : > { %838 = vmatpush.bf16.msra.mxu3 %v1352_v31  ;;  %797 = vmatmul.bf16.vlgmr.msra.gmra.mxu0 %v1028_v45 }
  0x53   : > { %845 = vmatpush.bf16.msrb.mxu0 %v1367_v32  ;;  %811 = vmatmul.bf16.vlgmr.msra.gmra.mxu1 %v1032_v47  ;;  %v364_v32 = vld [vmem:[#allocation7 + $0x8] sm:$0xff] }
  0x54   : > { %859 = vmatpush.bf16.msrb.mxu1 %v1375_v33  ;;  %825 = vmatmul.bf16.vlgmr.msra.gmra.mxu2 %v1036_v44 }
  0x55   : > { %873 = vmatpush.bf16.msrb.mxu2 %v1383_v42  ;;  %839 = vmatmul.bf16.vlgmr.msra.gmra.mxu3 %v1040_v46 }
  0x56   : > { %887 = vmatpush.bf16.msrb.mxu3 %v1391_v43 }
  0x57   : > { %846 = vmatpush.bf16.msrb.mxu0 %v1366_v48 }
  0x58   : > { %860 = vmatpush.bf16.msrb.mxu1 %v1374_v49 }
  0x59   : > { %874 = vmatpush.bf16.msrb.mxu2 %v1382_v50 }
  0x5a   : > { %888 = vmatpush.bf16.msrb.mxu3 %v1390_v51 }
  0x5b   : > { %847 = vmatpush.bf16.msrb.mxu0 %v1365_v52 }
  0x5c   : > { %861 = vmatpush.bf16.msrb.mxu1 %v1373_v53 }
  0x5d   : > { %875 = vmatpush.bf16.msrb.mxu2 %v1381_v54 }
  0x5e   : > { %889 = vmatpush.bf16.msrb.mxu3 %v1389_v55 }
  0x5f   : > { %848 = vmatpush.bf16.msrb.mxu0 %v1364_v56 }
  0x60   : > { %862 = vmatpush.bf16.msrb.mxu1 %v1372_v57 }
  0x61   : > { %876 = vmatpush.bf16.msrb.mxu2 %v1380_v58 }
  0x62   : > { %890 = vmatpush.bf16.msrb.mxu3 %v1388_v59 }
  0x63   : > { %849 = vmatpush.bf16.msrb.mxu0 %v1363_v60 }
  0x64   : > { %863 = vmatpush.bf16.msrb.mxu1 %v1371_v61 }
  0x65   : > { %877 = vmatpush.bf16.msrb.mxu2 %v1379_v62 }
  0x66   : > { %891 = vmatpush.bf16.msrb.mxu3 %v1387_v63 }
  0x67   : > { %850 = vmatpush.bf16.msrb.mxu0 %v1362_v0 }
  0x68   : > { %864 = vmatpush.bf16.msrb.mxu1 %v1370_v1 }
  0x69   : > { %878 = vmatpush.bf16.msrb.mxu2 %v1378_v2 }
  0x6a   : > { %892 = vmatpush.bf16.msrb.mxu3 %v1386_v3 }
  0x6b   : > { %851 = vmatpush.bf16.msrb.mxu0 %v1361_v4 }
  0x6c   : > { %865 = vmatpush.bf16.msrb.mxu1 %v1369_v5 }
  0x6d   : > { %879 = vmatpush.bf16.msrb.mxu2 %v1377_v6 }
  0x6e   : > { %893 = vmatpush.bf16.msrb.mxu3 %v1385_v7 }
  0x6f   : > { %852 = vmatpush.bf16.msrb.mxu0 %v1360_v8 }
  0x70   : > { %866 = vmatpush.bf16.msrb.mxu1 %v1368_v9 }
  0x71   : > { %880 = vmatpush.bf16.msrb.mxu2 %v1376_v10 }
  0x72   : > { %894 = vmatpush.bf16.msrb.mxu3 %v1384_v11  ;;  %853 = vmatmul.bf16.vlgmr.msrb.gmra.mxu0 %v1044_v20 }
  0x73   : > { %867 = vmatmul.bf16.vlgmr.msrb.gmra.mxu1 %v1048_v21 }
  0x74   : > { %881 = vmatmul.bf16.vlgmr.msrb.gmra.mxu2 %v1052_v22 }
  0x75   : > { %895 = vmatmul.bf16.vlgmr.msrb.gmra.mxu3 %v1056_v23 }
  0xcf   : > { %v798_v24 = vpop.f32.mrf.mxu0 }
  0xd0   : > { %v812_v26 = vpop.f32.mrf.mxu1  ;;  %v799_v27 = vadd.f32 %v798_v24, %v363_v25 }
  0xd2   : > { %v813_v30 = vadd.f32 %v812_v26, %v799_v27 }
  0xd7   : > { %v826_v28 = vpop.f32.mrf.mxu2  ;;  %v800_v31 = vpop.f32.mrf.mxu0 }
  0xd8   : > { %v840_v29 = vpop.f32.mrf.mxu3  ;;  %v814_v33 = vpop.f32.mrf.mxu1  ;;  %v827_v34 = vadd.f32 %v826_v28, %v813_v30  ;;  %v801_v35 = vadd.f32 %v800_v31, %v364_v32 }
  0xda   : > { %v841_v38 = vadd.f32 %v840_v29, %v827_v34  ;;  %v815_v39 = vadd.f32 %v814_v33, %v801_v35 }
  0xdf   : > { %v828_v36 = vpop.f32.mrf.mxu2 }
  0xe0   : > { %v842_v37 = vpop.f32.mrf.mxu3  ;;  %v829_v43 = vadd.f32 %v828_v36, %v815_v39 }
  0xe2   : > { %v843_v47 = vadd.f32 %v842_v37, %v829_v43 }
  0xef   : > { %v854_v40 = vpop.f32.mrf.mxu0 }
  0xf0   : > { %v855_v41 = vadd.f32 %v854_v40, %v841_v38  ;;  %v868_v42 = vpop.f32.mrf.mxu1 }
  0xf2   : > { %v869_v44 = vadd.f32 %v868_v42, %v855_v41 }
  0xf7   : > { %v882_v45 = vpop.f32.mrf.mxu2  ;;  %v856_v49 = vpop.f32.mrf.mxu0 }
  0xf8   : > { %v896_v46 = vpop.f32.mrf.mxu3  ;;  %v883_v48 = vadd.f32 %v882_v45, %v869_v44  ;;  %v857_v51 = vadd.f32 %v856_v49, %v843_v47  ;;  %v870_v52 = vpop.f32.mrf.mxu1 }
  0xfa   : > { %v897_v50 = vadd.f32 %v896_v46, %v883_v48  ;;  %v871_v53 = vadd.f32 %v870_v52, %v857_v51 }
  0xfc   : > { %901 = vst [vmem:[%s224_s4] sm:$0xff] %v897_v50 }
  0xff   : > { %v884_v54 = vpop.f32.mrf.mxu2 }
 0x100   : > { %v885_v55 = vadd.f32 %v884_v54, %v871_v53  ;;  %v898_v56 = vpop.f32.mrf.mxu3 }
 0x102   : > { %v899_v57 = vadd.f32 %v898_v56, %v885_v55 }
 0x104   : > { %902 = vst [vmem:[%s224_s4 + $0x8] sm:$0xff] %v899_v57 }
 0x105   : > { %1585 = shalt.err (!%p1582_p10)
}
 0x106   : > { %s1638_s25 = smov 128   ;;  %s1639_s27 = smov 8  }
 0x107   : > { %1403 = dma.vmem_to_hbm [thread:$0]  (%p1729_p5), %s917_s6, 256, %s919_s7, %s904_s16, %s1638_s25, %s1638_s25, %s1639_s27  }
 0x108 PF: > { %s933_s5 = sand.u32 1, %s1616_s12   ;;  %p1829_p12 = scmp.ge.s32.totalorder %s1628_s15, 2 }
 0x109   : > { %s934_s18 = scalar_lea.sflag [#allocation4], %s933_s5 }
 0x10a   : > { %p1417_p13 = pnand %p1829_p12, %p1695_p6 }
 0x10c   : > { %p1418_p0 = pneg %p1417_p13 }
 0x10e   : > { %1611 = dma.done.wait (%p1418_p0), %s934_s18, 256  }
 0x10f   : > { %1613 = vsyncadd (%p1418_p0), %s934_s18, 4294967040  ;;  %p17_p3 = scmp.ge.s32.totalorder %s1716_s8, 4   ;;  %s1830_s12 = smov %s1620_s13 }
 0x110   : > { %s1831_s13 = smov %s1624_s14  ;;  %s1832_s14 = smov %s1725_s11 }
 0x111   : > { %s1833_s15 = smov %s1716_s8  ;;  %19 = sbr.rel (!%p17_p3) target bundleno = 6 (0x6), region = 85 }
 0x116   :  { %940 = vsyncpa [#allocation3], 1 }
 0x117   :  { %942 = vsyncpa [#allocation3 + $0x1], 1 }
 0x118   :  { %943 = vsyncpa [#allocation6], 1 }
 0x119   :  { %944 = vsyncpa [#allocation4], 1 }
 0x11a   :  { %946 = vsyncpa [#allocation4 + $0x1], 1 }

// kernel: tpu_custom_call.1
= control target key start
LH: loop header
LB: loop body
LE: loop exit
PB: predicated region body
PF: predicated region fallthrough
CT: control target
= control target key end

     0   :  { %8 = vsyncpa [#allocation3], 0  ;;  %s1820_s0 = inlined_call_operand.hbm [shape: bf16[32,1024], index: 0, kind: input, shape index: {}]   ;;  %s1821_s1 = inlined_call_operand.hbm [shape: bf16[1024,128], index: 1, kind: input, shape index: {}]   ;;  %s1822_s2 = inlined_call_operand.hbm [shape: f32[16,128], index: 2, kind: input, shape index: {}]   ;;  %s1823_s3 = inlined_call_operand.hbm [shape: f32[32,128], index: 3, kind: output, shape index: {}]  }
   0x1   :  { %10 = vsyncpa [#allocation3 + $0x1], 0 }
   0x2   :  { %11 = vsyncpa [#allocation6], 0 }
   0x3   :  { %12 = vsyncpa [#allocation4], 0 }
   0x4   :  { %14 = vsyncpa [#allocation4 + $0x1], 0  ;;  %s1660_s12 = smov 0   ;;  %s1662_s13 = smov 0  }
   0x5   :  { %s1664_s14 = smov 0   ;;  %s1666_s15 = smov 0  }
   0x6 LB: > { %s1681_s16 = sadd.s32 4294967295, %s1628_s15   ;;  %s1011_s17 = sadd.s32 4294967294, %s1628_s15   ;;  %s1628_s15 = sphi %s1666_s15, %s1833_s15   ;;  %s1624_s14 = sphi %s1664_s14, %s1832_s14   ;;  %s1620_s13 = sphi %s1662_s13, %s1831_s13   ;;  %s1616_s12 = sphi %s1660_s12, %s1830_s12  }
   0x7   : > { %p40_p0 = scmp.ne.s32.totalorder %s1620_s13, %s1616_s12  ;;  %p41_p1 = scmp.eq.s32.totalorder %s1681_s16, 0 }
   0x8   : > { %p106_p2 = scmp.eq.s32.totalorder %s1681_s16, 1  ;;  %p112_p3 = scmp.eq.s32.totalorder %s1011_s17, 1 }
   0x9   : > { %p1690_p4 = por %p41_p1, %p40_p0  ;;  %p1012_p5 = scmp.ge.s32.totalorder %s1628_s15, 1 }
   0xa   : > { %p1695_p6 = por %p112_p3, %p40_p0  ;;  %p119_p7 = scmp.lt.s32.totalorder %s1628_s15, 3 }
   0xb   : > { %s130_s22 = sshll.u32 %s1821_s1, 4  ;;  %s1630_s24 = smov [#allocation5]   ;;  %s131_s22 = int_to_ptr.hbm [resolvable:$true] %s130_s22 }
   0xc   : > { %p1703_p8 = pnand %p1012_p5, %p119_p7  ;;  %s132_s25 = sshll.u32 %s1630_s24, 4  ;;  %s133_s25 = int_to_ptr.vmem [resolvable:$true] %s132_s25 }
   0xd   : > { %s144_s28 = sshll.u32 %s1822_s2, 4  ;;  %s1631_s29 = smov 64   ;;  %s145_s28 = int_to_ptr.hbm [resolvable:$true] %s144_s28 }
   0xe   : > { %p1405_p9 = pneg %p1703_p8  ;;  %s1632_s30 = smov 4  }
   0xf   : > { %s1633_s4 = smov [#allocation7]   ;;  %s1634_s6 = smov 128  }
  0x10   : > { %p1406_p10 = pnand %p1405_p9, %p41_p1  ;;  %s146_s5 = sshll.u32 %s1633_s4, 4  ;;  %s147_s5 = int_to_ptr.vmem [resolvable:$true] %s146_s5 }
  0x11   : > { %s1635_s7 = smov 8   ;;  %s1716_s8 = sadd.s32 1, %s1628_s15  }
  0x12   : > { %1408 = dma.hbm_to_vmem [thread:$0]  (!%p1406_p10), %s131_s22, 8192, %s133_s25, [#allocation6], %s1631_s29, %s1631_s29, %s1632_s30  }
  0x13   : > { %1411 = dma.hbm_to_vmem [thread:$0]  (!%p1406_p10), %s145_s28, 256, %s147_s5, [#allocation6], %s1634_s6, %s1634_s6, %s1635_s7  }
  0x14   : > { %s24_s9 = ssub.s32 %s1628_s15, %s1716_s8  ;;  %s27_s10 = sadd.s32 1, %s1624_s14 }
  0x15   : > { %p25_p12 = scmp.eq.s32.totalorder %s24_s9, 0  ;;  %p34_p13 = scmp.ne.s32.totalorder %s1624_s14, %s1620_s13 }
  0x16   : > { %p35_p0 = scmp.eq.s32.totalorder %s1628_s15, 0  ;;  %p1422_p7 = scmp.lt.s32.totalorder %s1628_s15, 2 }
  0x17   : > { %s1725_s11 = scalar_select %p25_p12, %s1624_s14, %s27_s10  }
  0x18   : > { %p36_p3 = por %p35_p0, %p34_p13  ;;  %p1729_p5 = por %p106_p2, %p34_p13 }
  0x19   : > { %s160_s20 = sand.u32 1, %s1624_s14   ;;  %s1319_s22 = sshll.u32 %s1628_s15, 6 }
  0x1a   : > { %s1016_s21 = sshll.u32 %s160_s20, 6  ;;  %s170_s26 = scalar_lea.hbm %s1820_s0, %s1319_s22 }
  0x1b   : > { %s164_s27 = scalar_lea.vmem [#allocation2], %s1016_s21  ;;  %s171_s29 = sshll.u32 %s170_s26, 4  ;;  %s172_s29 = int_to_ptr.hbm [resolvable:$true] %s171_s29 }
  0x1c   : > { %s173_s28 = sshll.u32 %s164_s27, 4  ;;  %p1739_p9 = pnand %p1422_p7, %p36_p3  ;;  %s174_s28 = int_to_ptr.vmem [resolvable:$true] %s173_s28 }
  0x1d   : > { %s161_s4 = scalar_lea.sflag [#allocation3], %s160_s20  ;;  %s1528_s5 = sshra.s32 %s172_s29, 4  ;;  %s1529_s5 = int_to_ptr.hbm [resolvable:$true] %s1528_s5 }
  0x1e   : > { %s1530_s6 = scalar_lea.hbm %s1529_s5, 64  ;;  %p1532_p10 = pneg %p1739_p9 }
  0x1f   : > { %p1531_p2 = scmp.ne.s32.totalorder %s1529_s5, %s1530_s6  ;;  %s1535_s10 = scalar_lea.hbm %s1820_s0, 128 }
  0x20   : > { %p1536_p0 = scmp.lt.s32.totalorder %s1529_s5, %s1820_s0  ;;  %p1537_p3 = scmp.lt.s32.totalorder %s1535_s10, %s1530_s6 }
  0x21   : > { %p1533_p12 = pnand %p1532_p10, %p1531_p2 }
  0x22   : > { %p1538_p7 = por %p1537_p3, %p1536_p0 }
  0x23   : > { %p1534_p13 = pneg %p1533_p12 }
  0x25   : > { %p1539_p11 = pnand %p1538_p7, %p1534_p13 }
  0x27   : > { %1542 = shalt.err (!%p1539_p11)
}
  0x28   : > { %s1636_s20 = smov 512   ;;  %s1637_s24 = smov 32  }
  0x29   : > { %1415 = dma.hbm_to_vmem [thread:$0]  (!%p1739_p9), %s172_s29, 1024, %s174_s28, %s161_s4, %s1636_s20, %s1636_s20, %s1637_s24  }
  0x2a   : > { %185 = sbr.rel (%p1703_p8) target bundleno = 264 (0x108), region = 32  ;;  %s1756_s25 = sand.u32 (!%p1703_p8), 1, %s1620_s13  }
  0x2b   : > { %s1021_s26 = sshll.u32 (!%p1703_p8), %s1756_s25, 6  ;;  %s188_s27 = scalar_lea.sflag (!%p1703_p8), [#allocation3], %s1756_s25 }
  0x2c   : > { %s1760_s5 = scalar_lea.vmem (!%p1703_p8), [#allocation2], %s1021_s26 }
  0x2f   : > { %1603 = dma.done.wait (%p1690_p4), %s188_s27, 1024  }
  0x30   : > { %1605 = vsyncadd (%p1690_p4), %s188_s27, 4294966272 }
  0x31   : > { %1607 = dma.done.wait (%p41_p1), [#allocation6], 8448  }
  0x32   : > { %1609 = vsyncadd (%p41_p1), [#allocation6], 4294958848  ;;  %v1335_v0 = vld [vmem:[#allocation5 + $0x38] sm:$0xff]  ;;  %v1334_v4 = vld [vmem:[#allocation5 + $0x30] sm:$0xff]  ;;  %s1024_s18 = sshll.u32 %s1756_s25, 4  ;;  %s1392_s23 = sshll.u32 %s1681_s16, 4 }
  0x33   : > { %v1343_v1 = vld [vmem:[#allocation5 + $0x78] sm:$0xff]  ;;  %789 = vmatpush.bf16.msra.mxu0 %v1335_v0  ;;  %v1342_v5 = vld [vmem:[#allocation5 + $0x70] sm:$0xff]  ;;  %v1333_v8 = vld [vmem:[#allocation5 + $0x28] sm:$0xff]  ;;  %s915_s30 = scalar_lea.hbm %s1823_s3, %s1392_s23  ;;  %s224_s4 = scalar_lea.vmem [#allocation8], %s1024_s18 }
  0x34   : > { %v1351_v2 = vld [vmem:[#allocation5 + $0xb8] sm:$0xff]  ;;  %803 = vmatpush.bf16.msra.mxu1 %v1343_v1  ;;  %v1350_v6 = vld [vmem:[#allocation5 + $0xb0] sm:$0xff]  ;;  %v1341_v9 = vld [vmem:[#allocation5 + $0x68] sm:$0xff]  ;;  %s916_s6 = sshll.u32 %s224_s4, 4  ;;  %s918_s7 = sshll.u32 %s915_s30, 4  ;;  %s917_s6 = int_to_ptr.vmem [resolvable:$true] %s916_s6  ;;  %s919_s7 = int_to_ptr.hbm [resolvable:$true] %s918_s7 }
  0x35   : > { %v1359_v3 = vld [vmem:[#allocation5 + $0xf8] sm:$0xff]  ;;  %817 = vmatpush.bf16.msra.mxu2 %v1351_v2  ;;  %v1358_v7 = vld [vmem:[#allocation5 + $0xf0] sm:$0xff]  ;;  %v1349_v10 = vld [vmem:[#allocation5 + $0xa8] sm:$0xff]  ;;  %s904_s16 = scalar_lea.sflag [#allocation4], %s1756_s25  ;;  %s1572_s9 = sshra.s32 %s919_s7, 4  ;;  %s1573_s9 = int_to_ptr.hbm [resolvable:$true] %s1572_s9 }
  0x36   : > { %831 = vmatpush.bf16.msra.mxu3 %v1359_v3  ;;  %v1357_v11 = vld [vmem:[#allocation5 + $0xe8] sm:$0xff]  ;;  %v1332_v12 = vld [vmem:[#allocation5 + $0x20] sm:$0xff]  ;;  %v1331_v16 = vld [vmem:[#allocation5 + $0x18] sm:$0xff]  ;;  %s1574_s10 = scalar_lea.hbm %s1573_s9, 16  ;;  %s1578_s20 = scalar_lea.hbm %s1823_s3, 32 }
  0x37   : > { %790 = vmatpush.bf16.msra.mxu0 %v1334_v4  ;;  %v1340_v13 = vld [vmem:[#allocation5 + $0x60] sm:$0xff]  ;;  %v1339_v17 = vld [vmem:[#allocation5 + $0x58] sm:$0xff]  ;;  %v1330_v20 = vld [vmem:[#allocation5 + $0x10] sm:$0xff]  ;;  %p1575_p1 = scmp.ne.s32.totalorder %s1573_s9, %s1574_s10  ;;  %p1579_p11 = scmp.lt.s32.totalorder %s1573_s9, %s1823_s3 }
  0x38   : > { %804 = vmatpush.bf16.msra.mxu1 %v1342_v5  ;;  %v1348_v14 = vld [vmem:[#allocation5 + $0xa0] sm:$0xff]  ;;  %v1347_v18 = vld [vmem:[#allocation5 + $0x98] sm:$0xff]  ;;  %v1338_v21 = vld [vmem:[#allocation5 + $0x50] sm:$0xff]  ;;  %p1580_p9 = scmp.lt.s32.totalorder %s1578_s20, %s1574_s10 }
  0x39   : > { %818 = vmatpush.bf16.msra.mxu2 %v1350_v6  ;;  %v1356_v15 = vld [vmem:[#allocation5 + $0xe0] sm:$0xff]  ;;  %v1355_v19 = vld [vmem:[#allocation5 + $0xd8] sm:$0xff]  ;;  %v1346_v22 = vld [vmem:[#allocation5 + $0x90] sm:$0xff]  ;;  %p1576_p4 = pnand %p1575_p1, %p1729_p5 }
  0x3a   : > { %832 = vmatpush.bf16.msra.mxu3 %v1358_v7  ;;  %v1354_v23 = vld [vmem:[#allocation5 + $0xd0] sm:$0xff]  ;;  %v1329_v24 = vld [vmem:[#allocation5 + $0x8] sm:$0xff]  ;;  %v1328_v28 = vld [vmem:[#allocation5] sm:$0xff]  ;;  %p1581_p2 = por %p1580_p9, %p1579_p11 }
  0x3b   : > { %791 = vmatpush.bf16.msra.mxu0 %v1333_v8  ;;  %v1337_v25 = vld [vmem:[#allocation5 + $0x48] sm:$0xff]  ;;  %v1336_v29 = vld [vmem:[#allocation5 + $0x40] sm:$0xff]  ;;  %v1367_v32 = vld [vmem:[#allocation5 + $0x138] sm:$0xff]  ;;  %p1577_p8 = pneg %p1576_p4 }
  0x3c   : > { %805 = vmatpush.bf16.msra.mxu1 %v1341_v9  ;;  %v1345_v26 = vld [vmem:[#allocation5 + $0x88] sm:$0xff]  ;;  %v1344_v30 = vld [vmem:[#allocation5 + $0x80] sm:$0xff]  ;;  %v1375_v33 = vld [vmem:[#allocation5 + $0x178] sm:$0xff] }
  0x3d   : > { %819 = vmatpush.bf16.msra.mxu2 %v1349_v10  ;;  %v1353_v27 = vld [vmem:[#allocation5 + $0xc8] sm:$0xff]  ;;  %v1352_v31 = vld [vmem:[#allocation5 + $0xc0] sm:$0xff]  ;;  %v1383_v42 = vld [vmem:[#allocation5 + $0x1b8] sm:$0xff]  ;;  %p1582_p10 = pnand %p1581_p2, %p1577_p8 }
  0x3e   : > { %833 = vmatpush.bf16.msra.mxu3 %v1357_v11  ;;  %v1035_v34 = vld [vmem:[%s1760_s5 + $0x8] sm:$0xf]  ;;  %v1027_v36 = vld [vmem:[%s1760_s5] sm:$0xf]  ;;  %v1321_v38 = vld [vmem:[%s1760_s5 + $0xc] sm:$0xf] }
  0x3f   : > { %792 = vmatpush.bf16.msra.mxu0 %v1332_v12  ;;  %v1325_v35 = vld [vmem:[%s1760_s5 + $0x24] sm:$0xf0]  ;;  %v1324_v37 = vld [vmem:[%s1760_s5 + $0x1c] sm:$0xf0]  ;;  %v1037_v39 = vld [vmem:[%s1760_s5 + $0x28] sm:$0xf0] }
  0x40   : > { %806 = vmatpush.bf16.msra.mxu1 %v1340_v13  ;;  %v1320_v40 = vld [vmem:[%s1760_s5 + $0x4] sm:$0xf]  ;;  %v1391_v43 = vld [vmem:[#allocation5 + $0x1f8] sm:$0xff]  ;;  %v1036_v44 = vor.u32 %v1325_v35, %v1035_v34  ;;  %v1028_v45 = vor.u32 %v1324_v37, %v1027_v36  ;;  %v1040_v46 = vor.u32 %v1321_v38, %v1037_v39  ;;  %v1366_v48 = vld [vmem:[#allocation5 + $0x130] sm:$0xff] }
  0x41   : > { %820 = vmatpush.bf16.msra.mxu2 %v1348_v14  ;;  %v1029_v41 = vld [vmem:[%s1760_s5 + $0x20] sm:$0xf0]  ;;  %v1374_v49 = vld [vmem:[#allocation5 + $0x170] sm:$0xff]  ;;  %v1365_v52 = vld [vmem:[#allocation5 + $0x128] sm:$0xff] }
  0x42   : > { %834 = vmatpush.bf16.msra.mxu3 %v1356_v15  ;;  %v1032_v47 = vor.u32 %v1320_v40, %v1029_v41  ;;  %v1382_v50 = vld [vmem:[#allocation5 + $0x1b0] sm:$0xff]  ;;  %v1373_v53 = vld [vmem:[#allocation5 + $0x168] sm:$0xff]  ;;  %v1364_v56 = vld [vmem:[#allocation5 + $0x120] sm:$0xff] }
  0x43   : > { %793 = vmatpush.bf16.msra.mxu0 %v1331_v16  ;;  %v1390_v51 = vld [vmem:[#allocation5 + $0x1f0] sm:$0xff]  ;;  %v1381_v54 = vld [vmem:[#allocation5 + $0x1a8] sm:$0xff]  ;;  %v1372_v57 = vld [vmem:[#allocation5 + $0x160] sm:$0xff] }
  0x44   : > { %807 = vmatpush.bf16.msra.mxu1 %v1339_v17  ;;  %v1389_v55 = vld [vmem:[#allocation5 + $0x1e8] sm:$0xff]  ;;  %v1380_v58 = vld [vmem:[#allocation5 + $0x1a0] sm:$0xff]  ;;  %v1363_v60 = vld [vmem:[#allocation5 + $0x118] sm:$0xff] }
  0x45   : > { %821 = vmatpush.bf16.msra.mxu2 %v1347_v18  ;;  %v1388_v59 = vld [vmem:[#allocation5 + $0x1e0] sm:$0xff]  ;;  %v1371_v61 = vld [vmem:[#allocation5 + $0x158] sm:$0xff]  ;;  %v1362_v0 = vld [vmem:[#allocation5 + $0x110] sm:$0xff] }
  0x46   : > { %835 = vmatpush.bf16.msra.mxu3 %v1355_v19  ;;  %v1379_v62 = vld [vmem:[#allocation5 + $0x198] sm:$0xff]  ;;  %v1370_v1 = vld [vmem:[#allocation5 + $0x150] sm:$0xff]  ;;  %v1361_v4 = vld [vmem:[#allocation5 + $0x108] sm:$0xff] }
  0x47   : > { %794 = vmatpush.bf16.msra.mxu0 %v1330_v20  ;;  %v1387_v63 = vld [vmem:[#allocation5 + $0x1d8] sm:$0xff]  ;;  %v1378_v2 = vld [vmem:[#allocation5 + $0x190] sm:$0xff]  ;;  %v1369_v5 = vld [vmem:[#allocation5 + $0x148] sm:$0xff] }
  0x48   : > { %808 = vmatpush.bf16.msra.mxu1 %v1338_v21  ;;  %v1386_v3 = vld [vmem:[#allocation5 + $0x1d0] sm:$0xff]  ;;  %v1377_v6 = vld [vmem:[#allocation5 + $0x188] sm:$0xff]  ;;  %v1360_v8 = vld [vmem:[#allocation5 + $0x100] sm:$0xff] }
  0x49   : > { %822 = vmatpush.bf16.msra.mxu2 %v1346_v22  ;;  %v1385_v7 = vld [vmem:[#allocation5 + $0x1c8] sm:$0xff]  ;;  %v1368_v9 = vld [vmem:[#allocation5 + $0x140] sm:$0xff]  ;;  %v1043_v12 = vld [vmem:[%s1760_s5 + $0x10] sm:$0xf] }
  0x4a   : > { %836 = vmatpush.bf16.msra.mxu3 %v1354_v23  ;;  %v1376_v10 = vld [vmem:[#allocation5 + $0x180] sm:$0xff]  ;;  %v1326_v13 = vld [vmem:[%s1760_s5 + $0x2c] sm:$0xf0]  ;;  %v1322_v14 = vld [vmem:[%s1760_s5 + $0x14] sm:$0xf] }
  0x4b   : > { %795 = vmatpush.bf16.msra.mxu0 %v1329_v24  ;;  %v1384_v11 = vld [vmem:[#allocation5 + $0x1c0] sm:$0xff]  ;;  %v1045_v15 = vld [vmem:[%s1760_s5 + $0x30] sm:$0xf0]  ;;  %v1051_v16 = vld [vmem:[%s1760_s5 + $0x18] sm:$0xf]  ;;  %v1044_v20 = vor.u32 %v1326_v13, %v1043_v12 }
  0x4c   : > { %809 = vmatpush.bf16.msra.mxu1 %v1337_v25  ;;  %v1327_v17 = vld [vmem:[%s1760_s5 + $0x34] sm:$0xf0]  ;;  %v1323_v18 = vld [vmem:[%s1760_s5 + $0x1c] sm:$0xf]  ;;  %v1048_v21 = vor.u32 %v1322_v14, %v1045_v15  ;;  %v363_v25 = vld [vmem:[#allocation7] sm:$0xff] }
  0x4d   : > { %823 = vmatpush.bf16.msra.mxu2 %v1345_v26  ;;  %v1053_v19 = vld [vmem:[%s1760_s5 + $0x38] sm:$0xf0]  ;;  %v1052_v22 = vor.u32 %v1327_v17, %v1051_v16 }
  0x4e   : > { %837 = vmatpush.bf16.msra.mxu3 %v1353_v27  ;;  %v1056_v23 = vor.u32 %v1323_v18, %v1053_v19 }
  0x4f   : > { %796 = vmatpush.bf16.msra.mxu0 %v1328_v28 }
  0x50   : > { %810 = vmatpush.bf16.msra.mxu1 %v1336_v29 }
  0x51   : > { %824 = vmatpush.bf16.msra.mxu2 %v1344_v30 }
  0x52   : > { %838 = vmatpush.bf16.msra.mxu3 %v1352_v31  ;;  %797 = vmatmul.bf16.vlgmr.msra.gmra.mxu0 %v1028_v45 }
  0x53   : > { %845 = vmatpush.bf16.msrb.mxu0 %v1367_v32  ;;  %811 = vmatmul.bf16.vlgmr.msra.gmra.mxu1 %v1032_v47  ;;  %v364_v32 = vld [vmem:[#allocation7 + $0x8] sm:$0xff] }
  0x54   : > { %859 = vmatpush.bf16.msrb.mxu1 %v1375_v33  ;;  %825 = vmatmul.bf16.vlgmr.msra.gmra.mxu2 %v1036_v44 }
  0x55   : > { %873 = vmatpush.bf16.msrb.mxu2 %v1383_v42  ;;  %839 = vmatmul.bf16.vlgmr.msra.gmra.mxu3 %v1040_v46 }
  0x56   : > { %887 = vmatpush.bf16.msrb.mxu3 %v1391_v43 }
  0x57   : > { %846 = vmatpush.bf16.msrb.mxu0 %v1366_v48 }
  0x58   : > { %860 = vmatpush.bf16.msrb.mxu1 %v1374_v49 }
  0x59   : > { %874 = vmatpush.bf16.msrb.mxu2 %v1382_v50 }
  0x5a   : > { %888 = vmatpush.bf16.msrb.mxu3 %v1390_v51 }
  0x5b   : > { %847 = vmatpush.bf16.msrb.mxu0 %v1365_v52 }
  0x5c   : > { %861 = vmatpush.bf16.msrb.mxu1 %v1373_v53 }
  0x5d   : > { %875 = vmatpush.bf16.msrb.mxu2 %v1381_v54 }
  0x5e   : > { %889 = vmatpush.bf16.msrb.mxu3 %v1389_v55 }
  0x5f   : > { %848 = vmatpush.bf16.msrb.mxu0 %v1364_v56 }
  0x60   : > { %862 = vmatpush.bf16.msrb.mxu1 %v1372_v57 }
  0x61   : > { %876 = vmatpush.bf16.msrb.mxu2 %v1380_v58 }
  0x62   : > { %890 = vmatpush.bf16.msrb.mxu3 %v1388_v59 }
  0x63   : > { %849 = vmatpush.bf16.msrb.mxu0 %v1363_v60 }
  0x64   : > { %863 = vmatpush.bf16.msrb.mxu1 %v1371_v61 }
  0x65   : > { %877 = vmatpush.bf16.msrb.mxu2 %v1379_v62 }
  0x66   : > { %891 = vmatpush.bf16.msrb.mxu3 %v1387_v63 }
  0x67   : > { %850 = vmatpush.bf16.msrb.mxu0 %v1362_v0 }
  0x68   : > { %864 = vmatpush.bf16.msrb.mxu1 %v1370_v1 }
  0x69   : > { %878 = vmatpush.bf16.msrb.mxu2 %v1378_v2 }
  0x6a   : > { %892 = vmatpush.bf16.msrb.mxu3 %v1386_v3 }
  0x6b   : > { %851 = vmatpush.bf16.msrb.mxu0 %v1361_v4 }
  0x6c   : > { %865 = vmatpush.bf16.msrb.mxu1 %v1369_v5 }
  0x6d   : > { %879 = vmatpush.bf16.msrb.mxu2 %v1377_v6 }
  0x6e   : > { %893 = vmatpush.bf16.msrb.mxu3 %v1385_v7 }
  0x6f   : > { %852 = vmatpush.bf16.msrb.mxu0 %v1360_v8 }
  0x70   : > { %866 = vmatpush.bf16.msrb.mxu1 %v1368_v9 }
  0x71   : > { %880 = vmatpush.bf16.msrb.mxu2 %v1376_v10 }
  0x72   : > { %894 = vmatpush.bf16.msrb.mxu3 %v1384_v11  ;;  %853 = vmatmul.bf16.vlgmr.msrb.gmra.mxu0 %v1044_v20 }
  0x73   : > { %867 = vmatmul.bf16.vlgmr.msrb.gmra.mxu1 %v1048_v21 }
  0x74   : > { %881 = vmatmul.bf16.vlgmr.msrb.gmra.mxu2 %v1052_v22 }
  0x75   : > { %895 = vmatmul.bf16.vlgmr.msrb.gmra.mxu3 %v1056_v23 }
  0xcf   : > { %v798_v24 = vpop.f32.mrf.mxu0 }
  0xd0   : > { %v812_v26 = vpop.f32.mrf.mxu1  ;;  %v799_v27 = vadd.f32 %v798_v24, %v363_v25 }
  0xd2   : > { %v813_v30 = vadd.f32 %v812_v26, %v799_v27 }
  0xd7   : > { %v826_v28 = vpop.f32.mrf.mxu2  ;;  %v800_v31 = vpop.f32.mrf.mxu0 }
  0xd8   : > { %v840_v29 = vpop.f32.mrf.mxu3  ;;  %v814_v33 = vpop.f32.mrf.mxu1  ;;  %v827_v34 = vadd.f32 %v826_v28, %v813_v30  ;;  %v801_v35 = vadd.f32 %v800_v31, %v364_v32 }
  0xda   : > { %v841_v38 = vadd.f32 %v840_v29, %v827_v34  ;;  %v815_v39 = vadd.f32 %v814_v33, %v801_v35 }
  0xdf   : > { %v828_v36 = vpop.f32.mrf.mxu2 }
  0xe0   : > { %v842_v37 = vpop.f32.mrf.mxu3  ;;  %v829_v43 = vadd.f32 %v828_v36, %v815_v39 }
  0xe2   : > { %v843_v47 = vadd.f32 %v842_v37, %v829_v43 }
  0xef   : > { %v854_v40 = vpop.f32.mrf.mxu0 }
  0xf0   : > { %v855_v41 = vadd.f32 %v854_v40, %v841_v38  ;;  %v868_v42 = vpop.f32.mrf.mxu1 }
  0xf2   : > { %v869_v44 = vadd.f32 %v868_v42, %v855_v41 }
  0xf7   : > { %v882_v45 = vpop.f32.mrf.mxu2  ;;  %v856_v49 = vpop.f32.mrf.mxu0 }
  0xf8   : > { %v896_v46 = vpop.f32.mrf.mxu3  ;;  %v883_v48 = vadd.f32 %v882_v45, %v869_v44  ;;  %v857_v51 = vadd.f32 %v856_v49, %v843_v47  ;;  %v870_v52 = vpop.f32.mrf.mxu1 }
  0xfa   : > { %v897_v50 = vadd.f32 %v896_v46, %v883_v48  ;;  %v871_v53 = vadd.f32 %v870_v52, %v857_v51 }
  0xfc   : > { %901 = vst [vmem:[%s224_s4] sm:$0xff] %v897_v50 }
  0xff   : > { %v884_v54 = vpop.f32.mrf.mxu2 }
 0x100   : > { %v885_v55 = vadd.f32 %v884_v54, %v871_v53  ;;  %v898_v56 = vpop.f32.mrf.mxu3 }
 0x102   : > { %v899_v57 = vadd.f32 %v898_v56, %v885_v55 }
 0x104   : > { %902 = vst [vmem:[%s224_s4 + $0x8] sm:$0xff] %v899_v57 }
 0x105   : > { %1585 = shalt.err (!%p1582_p10)
}
 0x106   : > { %s1638_s25 = smov 128   ;;  %s1639_s27 = smov 8  }
 0x107   : > { %1403 = dma.vmem_to_hbm [thread:$0]  (%p1729_p5), %s917_s6, 256, %s919_s7, %s904_s16, %s1638_s25, %s1638_s25, %s1639_s27  }
 0x108 PF: > { %s933_s5 = sand.u32 1, %s1616_s12   ;;  %p1829_p12 = scmp.ge.s32.totalorder %s1628_s15, 2 }
 0x109   : > { %s934_s18 = scalar_lea.sflag [#allocation4], %s933_s5 }
 0x10a   : > { %p1417_p13 = pnand %p1829_p12, %p1695_p6 }
 0x10c   : > { %p1418_p0 = pneg %p1417_p13 }
 0x10e   : > { %1611 = dma.done.wait (%p1418_p0), %s934_s18, 256  }
 0x10f   : > { %1613 = vsyncadd (%p1418_p0), %s934_s18, 4294967040  ;;  %p17_p3 = scmp.ge.s32.totalorder %s1716_s8, 4   ;;  %s1830_s12 = smov %s1620_s13 }
 0x110   : > { %s1831_s13 = smov %s1624_s14  ;;  %s1832_s14 = smov %s1725_s11 }
 0x111   : > { %s1833_s15 = smov %s1716_s8  ;;  %19 = sbr.rel (!%p17_p3) target bundleno = 6 (0x6), region = 85 }
 0x116   :  { %940 = vsyncpa [#allocation3], 1 }
 0x117   :  { %942 = vsyncpa [#allocation3 + $0x1], 1 }
 0x118   :  { %943 = vsyncpa [#allocation6], 1 }
 0x119   :  { %944 = vsyncpa [#allocation4], 1 }
 0x11a   :  { %946 = vsyncpa [#allocation4 + $0x1], 1 }

</bundles_post_ra>
